<compile_context>
chip_gen: v7x
topology: tpu7x:2x2x1
jax: 0.10.0
libtpu: 0.0.40
codegen_flags: <defaults>
</compile_context>

<pallas_src>
import functools

import jax
import jax.numpy as jnp
from jax.experimental import pallas as pl
from jax.experimental.pallas import tpu as pltpu

_MIB = 1 << 20
# Max f32 bytes of one fused (R, HW) block: keeps 2x in + 2x out blocks plus
# f32 temporaries well under 32 MiB scoped VMEM on every generation.
_FUSED_BLOCK_F32_MAX = 4 * _MIB
# Target bytes (actual dtype) per streamed block in the two-pass fallback.
_STREAM_BLOCK_BYTES = 2 * _MIB


def _round_down_mult(v, m):
    return (v // m) * m


# ---------------------------------------------------------------------------
# Fused single-pass kernel: one (R, HW) slab per grid step, rows = (n, c).
# ---------------------------------------------------------------------------
def _fused_kernel(x_ref, gamma_ref, beta_ref, o_ref, *, eps, inv_hw):
    x = x_ref[...].astype(jnp.float32)                         # (R, HW)
    mean = jnp.sum(x, axis=-1, keepdims=True) * inv_hw         # (R, 1)
    xc = x - mean
    var = jnp.sum(xc * xc, axis=-1, keepdims=True) * inv_hw    # centered: no
    rstd = jax.lax.rsqrt(var + eps)                            # cancellation
    scale = gamma_ref[...] * rstd                              # (R, 1)
    o_ref[...] = (xc * scale + beta_ref[...]).astype(o_ref.dtype)


# ---------------------------------------------------------------------------
# Two-pass fallback (x streamed from HBM twice) for very large instances.
# ---------------------------------------------------------------------------
def _stats_kernel(x_ref, gamma_ref, beta_ref, scale_ref, shift_ref,
                  ssum_ref, ssq_ref, *, eps, inv_hw, hw, tile, mask_tail):
    s = pl.program_id(1)

    @pl.when(s == 0)
    def _():
        ssum_ref[...] = jnp.zeros_like(ssum_ref)
        ssq_ref[...] = jnp.zeros_like(ssq_ref)

    x = x_ref[...].astype(jnp.float32)                         # (R, T)
    if mask_tail:                                              # static bool
        col = s * tile + jax.lax.broadcasted_iota(jnp.int32, x.shape, 1)
        x = jnp.where(col < hw, x, 0.0)
    ssum_ref[...] += jnp.sum(x, axis=-1, keepdims=True)
    ssq_ref[...] += jnp.sum(x * x, axis=-1, keepdims=True)

    @pl.when(s == pl.num_programs(1) - 1)
    def _():
        mean = ssum_ref[...] * inv_hw
        var = jnp.maximum(ssq_ref[...] * inv_hw - mean * mean, 0.0)
        rstd = jax.lax.rsqrt(var + eps)
        g_rstd = gamma_ref[...] * rstd
        scale_ref[...] = g_rstd
        shift_ref[...] = beta_ref[...] - mean * g_rstd


def _apply_kernel(x_ref, scale_ref, shift_ref, o_ref):
    x = x_ref[...].astype(jnp.float32)                         # (R, T)
    o_ref[...] = (x * scale_ref[...] + shift_ref[...]).astype(o_ref.dtype)


# ---------------------------------------------------------------------------
# Block-size heuristics.
# ---------------------------------------------------------------------------
def _pick_fused_row_block(rows, hw):
    """Rows per fused block: multiple of 8 (full sublanes) or the full extent."""
    cap = max(8, _round_down_mult(_FUSED_BLOCK_F32_MAX // (hw * 4), 8))
    if rows >= 16:
        # Keep >=2 grid steps so both v7x TensorCores have parallel work.
        cap = min(cap, max(8, _round_down_mult(rows // 2, 8)))
    if rows <= cap:
        return rows                      # full extent is always a legal block
    r = cap
    while r >= 8:                        # prefer a divisor (no padded tail)
        if rows % r == 0:
            return r
        r -= 8
    return cap                           # tail block padded by Pallas


def _pick_stream_blocks(rows, hw, itemsize):
    """(R, T) for the streamed fallback, ~_STREAM_BLOCK_BYTES per block."""
    if rows <= 8:
        r = rows
    else:
        for cand in (32, 16, 8):
            if rows % cand == 0:
                r = cand
                break
        else:
            r = 8
    cap_t = max(128, _round_down_mult(_STREAM_BLOCK_BYTES // (r * itemsize), 128))
    if hw <= cap_t:
        return r, hw
    t = cap_t
    while t >= 128:
        if hw % t == 0:
            return r, t
        t -= 128
    return r, cap_t                      # tail tile masked in the stats kernel


# ---------------------------------------------------------------------------
# Public wrapper.
# ---------------------------------------------------------------------------
def adaptive_instance_norm(x, styles, w1, b1, w2, b2, *, weight_scale=1.0,
                           eps=1e-5):
    """x: (N, C, H, W); styles: (N, F); w1/w2: (C, F); b1/b2: (C,).
    Returns instance_norm(x) * gamma[:, :, None, None] + beta[:, :, None, None]
    with gamma = styles @ (w1*weight_scale).T + b1 (and likewise beta)."""
    N, C, H, W = x.shape
    HW = H * W
    rows = N * C
    itemsize = jnp.dtype(x.dtype).itemsize
    inv_hw = 1.0 / float(HW)

    # Style affine is only N*C floats -> plain XLA matmul, fed as (rows, 1).
    sty = styles.astype(jnp.float32)
    gamma = (sty @ (w1.astype(jnp.float32) * float(weight_scale)).T
             + b1.astype(jnp.float32)).reshape(rows, 1)
    beta = (sty @ (w2.astype(jnp.float32) * float(weight_scale)).T
            + b2.astype(jnp.float32)).reshape(rows, 1)

    x_flat = x.reshape(rows, HW)

    # ---- Fused single pass: whole rows resident in VMEM ----
    if min(rows, 8) * HW * 4 <= _FUSED_BLOCK_F32_MAX:
        r = _pick_fused_row_block(rows, HW)
        blk_bytes = r * HW * itemsize
        blk_f32 = r * HW * 4
        # 2x in + 2x out double-buffered blocks + f32 temporaries + margin.
        vmem_limit = 4 * blk_bytes + 3 * blk_f32 + 2 * _MIB
        vmem_limit = int(min(max(vmem_limit, 32 * _MIB), 48 * _MIB))
        y = pl.pallas_call(
            functools.partial(_fused_kernel, eps=float(eps), inv_hw=inv_hw),
            out_shape=jax.ShapeDtypeStruct((rows, HW), x.dtype),
            grid_spec=pltpu.PrefetchScalarGridSpec(
                num_scalar_prefetch=0,
                grid=(pl.cdiv(rows, r),),
                in_specs=[
                    pl.BlockSpec((r, HW), lambda i: (i, 0)),
                    pl.BlockSpec((r, 1), lambda i: (i, 0)),
                    pl.BlockSpec((r, 1), lambda i: (i, 0)),
                ],
                out_specs=pl.BlockSpec((r, HW), lambda i: (i, 0)),
            ),
            compiler_params=pltpu.CompilerParams(
                dimension_semantics=("parallel",),
                vmem_limit_bytes=vmem_limit),
        )(x_flat, gamma, beta)
        return y.reshape(N, C, H, W)

    # ---- Streaming two-pass fallback: instance too big for VMEM ----
    r, t = _pick_stream_blocks(rows, HW, itemsize)
    grid_r = pl.cdiv(rows, r)
    grid_s = pl.cdiv(HW, t)
    mask_tail = (HW % t) != 0

    stats_vmem = int(min(max(2 * r * t * itemsize + 2 * r * t * 4 + 2 * _MIB,
                             32 * _MIB), 48 * _MIB))
    scale_rs, shift_rs = pl.pallas_call(
        functools.partial(_stats_kernel, eps=float(eps), inv_hw=inv_hw,
                          hw=HW, tile=t, mask_tail=mask_tail),
        out_shape=(jax.ShapeDtypeStruct((rows, 1), jnp.float32),
                   jax.ShapeDtypeStruct((rows, 1), jnp.float32)),
        grid_spec=pltpu.PrefetchScalarGridSpec(
            num_scalar_prefetch=0,
            grid=(grid_r, grid_s),
            in_specs=[
                pl.BlockSpec((r, t), lambda i, s: (i, s)),
                pl.BlockSpec((r, 1), lambda i, s: (i, 0)),
                pl.BlockSpec((r, 1), lambda i, s: (i, 0)),
            ],
            out_specs=[
                pl.BlockSpec((r, 1), lambda i, s: (i, 0)),
                pl.BlockSpec((r, 1), lambda i, s: (i, 0)),
            ],
            scratch_shapes=[pltpu.VMEM((r, 1), jnp.float32),
                            pltpu.VMEM((r, 1), jnp.float32)],
        ),
        compiler_params=pltpu.CompilerParams(
            dimension_semantics=("parallel", "arbitrary"),
            vmem_limit_bytes=stats_vmem),
    )(x_flat, gamma, beta)

    apply_vmem = int(min(max(4 * r * t * itemsize + 2 * r * t * 4 + 2 * _MIB,
                             32 * _MIB), 48 * _MIB))
    y = pl.pallas_call(
        _apply_kernel,
        out_shape=jax.ShapeDtypeStruct((rows, HW), x.dtype),
        grid_spec=pltpu.PrefetchScalarGridSpec(
            num_scalar_prefetch=0,
            grid=(grid_r, grid_s),
            in_specs=[
                pl.BlockSpec((r, t), lambda i, s: (i, s)),
                pl.BlockSpec((r, 1), lambda i, s: (i, 0)),
                pl.BlockSpec((r, 1), lambda i, s: (i, 0)),
            ],
            out_specs=pl.BlockSpec((r, t), lambda i, s: (i, s)),
        ),
        compiler_params=pltpu.CompilerParams(
            dimension_semantics=("parallel", "parallel"),
            vmem_limit_bytes=apply_vmem),
    )(x_flat, scale_rs, shift_rs)
    return y.reshape(N, C, H, W)


if __name__ == "__main__":
    key = jax.random.PRNGKey(0)
    k_x, k_s, k_w1, k_w2 = jax.random.split(key, 4)

    N, C, H, W = 2, 4, 16, 16        # batch, num_channels, spatial
    F = 32                           # num_features (style vector dim)
    variance_scale = 2.0
    # weight_scale=True path of the PyTorch Linear: weight ~ N(0,1),
    # runtime scale = sqrt(variance_scale / in_features); bias zero-init.
    w_scale = (variance_scale / F) ** 0.5

    x = jax.random.normal(k_x, (N, C, H, W), dtype=jnp.float32)
    styles = jax.random.normal(k_s, (N, F), dtype=jnp.float32)
    w1 = jax.random.normal(k_w1, (C, F), dtype=jnp.float32)
    w2 = jax.random.normal(k_w2, (C, F), dtype=jnp.float32)
    b1 = jnp.zeros((C,), dtype=jnp.float32)
    b2 = jnp.zeros((C,), dtype=jnp.float32)

    out = adaptive_instance_norm(x, styles, w1, b1, w2, b2,
                                 weight_scale=w_scale, eps=1e-5)
    out = jax.block_until_ready(out)

    # Pure-JAX reference mirroring the PyTorch forward.
    mean = jnp.mean(x, axis=(2, 3), keepdims=True)
    var = jnp.var(x, axis=(2, 3), keepdims=True)    # biased, as InstanceNorm2d
    x_norm = (x - mean) / jnp.sqrt(var + 1e-5)
    gamma = styles @ (w1 * w_scale).T + b1
    beta = styles @ (w2 * w_scale).T + b2
    ref = x_norm * gamma[:, :, None, None] + beta[:, :, None, None]

    assert out.shape == x.shape and out.dtype == x.dtype
    assert jnp.allclose(out, ref, atol=1e-4, rtol=1e-4), \
        float(jnp.max(jnp.abs(out - ref)))

    print("KERNEL_OK")
</pallas_src>

<mosaic_0001>
module attributes {stable_mosaic.version = 11 : i64} {
  func.func @_fused_kernel(%arg0: i32, %arg1: memref<8x256xf32, #tpu.memory_space<vmem>>, %arg2: memref<8x1xf32, #tpu.memory_space<vmem>>, %arg3: memref<8x1xf32, #tpu.memory_space<vmem>>, %arg4: memref<8x256xf32, #tpu.memory_space<vmem>>) attributes {dimension_semantics = [#tpu.dimension_semantics<parallel>], iteration_bounds = array<i64: 1>, scalar_prefetch = 0 : i64, scratch_operands = 0 : i64, tpu.core_type = #tpu.core_type<tc>, window_params = [{transform_indices = @transform_0, window_bounds = array<i64: 8, 256>}, {transform_indices = @transform_1, window_bounds = array<i64: 8, 1>}, {transform_indices = @transform_2, window_bounds = array<i64: 8, 1>}, {transform_indices = @transform_3, window_bounds = array<i64: 8, 256>}]} {
    %c0 = arith.constant 0 : index
    %c0_0 = arith.constant 0 : index
    %0 = vector.load %arg1[%c0, %c0_0] : memref<8x256xf32, #tpu.memory_space<vmem>>, vector<8x256xf32>
    %cst = arith.constant dense<0.000000e+00> : vector<8xf32>
    %1 = vector.multi_reduction <add>, %0, %cst [1] : vector<8x256xf32> to vector<8xf32>
    %2 = vector.shape_cast %1 : vector<8xf32> to vector<8x1xf32>
    %cst_1 = arith.constant 3.906250e-03 : f32
    %3 = vector.broadcast %cst_1 : f32 to vector<8x1xf32>
    %4 = arith.mulf %2, %3 : vector<8x1xf32>
    %5 = vector.broadcast %4 : vector<8x1xf32> to vector<8x256xf32>
    %6 = arith.subf %0, %5 : vector<8x256xf32>
    %7 = arith.mulf %6, %6 : vector<8x256xf32>
    %cst_2 = arith.constant dense<0.000000e+00> : vector<8xf32>
    %8 = vector.multi_reduction <add>, %7, %cst_2 [1] : vector<8x256xf32> to vector<8xf32>
    %9 = vector.shape_cast %8 : vector<8xf32> to vector<8x1xf32>
    %cst_3 = arith.constant 3.906250e-03 : f32
    %10 = vector.broadcast %cst_3 : f32 to vector<8x1xf32>
    %11 = arith.mulf %9, %10 : vector<8x1xf32>
    %cst_4 = arith.constant 9.99999974E-6 : f32
    %12 = vector.broadcast %cst_4 : f32 to vector<8x1xf32>
    %13 = arith.addf %11, %12 : vector<8x1xf32>
    %14 = math.rsqrt %13 : vector<8x1xf32>
    %c0_5 = arith.constant 0 : index
    %c0_6 = arith.constant 0 : index
    %15 = vector.load %arg2[%c0_5, %c0_6] : memref<8x1xf32, #tpu.memory_space<vmem>>, vector<8x1xf32>
    %16 = arith.mulf %15, %14 : vector<8x1xf32>
    %17 = vector.broadcast %16 : vector<8x1xf32> to vector<8x256xf32>
    %18 = arith.mulf %6, %17 : vector<8x256xf32>
    %c0_7 = arith.constant 0 : index
    %c0_8 = arith.constant 0 : index
    %19 = vector.load %arg3[%c0_7, %c0_8] : memref<8x1xf32, #tpu.memory_space<vmem>>, vector<8x1xf32>
    %20 = vector.broadcast %19 : vector<8x1xf32> to vector<8x256xf32>
    %21 = arith.addf %18, %20 : vector<8x256xf32>
    %c0_9 = arith.constant 0 : index
    %c0_10 = arith.constant 0 : index
    %22 = vector.load %arg4[%c0_9, %c0_10] : memref<8x256xf32, #tpu.memory_space<vmem>>, vector<8x256xf32>
    tpu.vector_store %arg4[%c0_9, %c0_10], %21 {strides = array<i32>} : memref<8x256xf32, #tpu.memory_space<vmem>>, vector<8x256xf32>,
    return
  }
  func.func @transform_0(%arg0: i32) -> (i32, i32) {
    %c0_i32 = arith.constant 0 : i32
    %c0_i32_0 = arith.constant 0 : i32
    return %arg0, %c0_i32 : i32, i32
  }
  func.func @transform_1(%arg0: i32) -> (i32, i32) {
    %c0_i32 = arith.constant 0 : i32
    %c0_i32_0 = arith.constant 0 : i32
    return %arg0, %c0_i32 : i32, i32
  }
  func.func @transform_2(%arg0: i32) -> (i32, i32) {
    %c0_i32 = arith.constant 0 : i32
    %c0_i32_0 = arith.constant 0 : i32
    return %arg0, %c0_i32 : i32, i32
  }
  func.func @transform_3(%arg0: i32) -> (i32, i32) {
    %c0_i32 = arith.constant 0 : i32
    %c0_i32_0 = arith.constant 0 : i32
    return %arg0, %c0_i32 : i32, i32
  }
}

</mosaic_0001>

<bundles_post_ra>
// kernel: tpu_custom_call.1
= control target key start
LH: loop header
LB: loop body
LE: loop exit
PB: predicated region body
PF: predicated region fallthrough
CT: control target
= control target key end

     0   :  { %s140_s0 = inlined_call_operand.vmem [shape: f32[8,256], index: 0, kind: input, shape index: {}]   ;;  %s141_s1 = inlined_call_operand.vmem [shape: f32[8,1], index: 1, kind: input, shape index: {}]   ;;  %s142_s2 = inlined_call_operand.vmem [shape: f32[8,1], index: 2, kind: input, shape index: {}]   ;;  %s143_s3 = inlined_call_operand.hbm [shape: f32[8,256], index: 3, kind: output, shape index: {}]  }
   0x1   :  { %v15_v0 = vld [vmem:[%s140_s0] sm:$0xff]  ;;  %v16_v1 = vld [vmem:[%s140_s0 + $0x8] sm:$0xff] }
   0x2   :  { %8 = vsyncpa [#allocation3], 0  ;;  %v17_v2 = vadd.f32 %v16_v1, %v15_v0  ;;  %v94_v10 = vmov 0   ;;  %v31_v14 = vld [vmem:[%s141_s1] sm:$0xff]  ;;  %s95_s19 = smov [#allocation2]  }
   0x3   :  { %66 = vset.pattern.permute.xlu1 %v94_v10  ;;  %67 = vset.pattern.permute.xlu0 %v94_v10  ;;  %v40_v17 = vld [vmem:[%s142_s2] sm:$0xff]  ;;  %s56_s20 = sshll.u32 %s95_s19, 4  ;;  %s57_s20 = int_to_ptr.vmem [resolvable:$true] %s56_s20 }
   0x4   :  { %18 = vadd.xlane.f32.xlu0 %v17_v2  ;;  %s70_s1 = scalar_lea.vmem %s57_s20, 256  ;;  %p75_p1 = scmp.lt.s32.totalorder %s57_s20, %s57_s20 }
   0x5   :  { %p71_p0 = scmp.ne.s32.totalorder %s57_s20, %s70_s1  ;;  %p76_p2 = scmp.lt.s32.totalorder %s70_s1, %s70_s1 }
   0x7   :  { %p77_p3 = por %p76_p2, %p75_p1 }
   0x9   :  { %p78_p4 = pnand %p77_p3, %p71_p0 }
  0x91   :  { %v19_v3 = vpop.xlane.xlu0 %18 }
  0x92   :  { %v20_v4 = vmul.f32 0.00390625, %v19_v3 }
  0x94   :  { %v21_v5 = vsub.f32 %v15_v0, %v20_v4  ;;  %v22_v6 = vsub.f32 %v16_v1, %v20_v4 }
  0x96   :  { %v23_v7 = vmul.f32 %v21_v5, %v21_v5  ;;  %v24_v8 = vmul.f32 %v22_v6, %v22_v6 }
  0x98   :  { %v25_v9 = vadd.f32 %v24_v8, %v23_v7 }
  0x9a   :  { %26 = vadd.xlane.f32.xlu0 %v25_v9 }
 0x127   :  { %v27_v11 = vpop.xlane.xlu0 %26 }
 0x128   :  { %v28_v12 = vmul.f32 0.00390625, %v27_v11 }
 0x12a   :  { %v29_v13 = vadd.f32 1e-05, %v28_v12 }
 0x12c   :  { %68 = vrsqrt.f32 %v29_v13 }
 0x136   :  { %v69_v15 = vpop.eup %68 }
 0x137   :  { %v32_v16 = vmul.f32 %v69_v15, %v31_v14 }
 0x139   :  { %35 = vperm.xlu1 %66, %v32_v16  }
 0x13d   :  { %43 = vperm.xlu1 %66, %v40_v17  }
 0x1b8   :  { %v36_v18 = vpop.permute.xlu1 %35 }
 0x1b9   :  { %v38_v19 = vmul.f32 %v36_v18, %v21_v5  ;;  %v39_v20 = vmul.f32 %v36_v18, %v22_v6 }
 0x1bc   :  { %v44_v21 = vpop.permute.xlu1 %43 }
 0x1bd   :  { %v46_v22 = vadd.f32 %v44_v21, %v38_v19  ;;  %v47_v23 = vadd.f32 %v44_v21, %v39_v20 }
 0x1bf   :  { %48 = vst [vmem:[#allocation2] sm:$0xff] %v46_v22  ;;  %49 = vst [vmem:[#allocation2 + $0x8] sm:$0xff] %v47_v23 }
 0x1c0   :  { %81 = shalt.err (!%p78_p4)
}
 0x1c1   :  { %s82_s22 = scalar_lea.hbm %s143_s3, 256 }
 0x1c2   :  { %p83_p5 = scmp.ne.s32.totalorder %s143_s3, %s82_s22  ;;  %p86_p6 = scmp.lt.u32.totalorder %s82_s22, %s143_s3 }
 0x1c4   :  { %p88_p7 = pnand %p86_p6, %p83_p5 }
 0x1c6   :  { %91 = shalt.err (!%p88_p7)
}
 0x1c7   :  { %59 = dma.vmem_to_hbm [thread:$0]  %s57_s20, 256, %s143_s3, [#allocation3]  }
 0x1c8   :  { %92 = dma.done.wait [#allocation3], 256  }
 0x1c9   :  { %93 = vsyncadd [#allocation3], 4294967040 }
 0x1ca   :  { %63 = vsyncpa [#allocation3], 1 }

</bundles_post_ra>
